<compile_context>
chip_gen: v5e
topology: v5e:2x2
jax: 0.10.0
libtpu: 0.0.40
codegen_flags: <defaults>
</compile_context>

<pallas_src>
import functools

import jax
import jax.numpy as jnp
from jax.experimental import pallas as pl
from jax.experimental.pallas import tpu as pltpu


def _linear_kernel(x_ref, w_ref, b_ref, o_ref):
    # x_ref: (tile_b, wsize) VMEM
    # w_ref: (1, wsize)      VMEM (native PyTorch row layout, broadcasts over rows)
    # b_ref: (1, 1)          SMEM scalar
    # o_ref: (tile_b, 1)     VMEM
    bias = b_ref[0, 0]
    acc = jnp.sum(x_ref[...] * w_ref[...], axis=-1, keepdims=True)  # VPU mul + XLU reduce
    o_ref[...] = (acc + bias).astype(o_ref.dtype)


@functools.partial(jax.jit, static_argnames=("tile_b",))
def simple_nn_forward(x, w, b, *, tile_b=1024):
    """x: (B, wsize) f32; w: (1, wsize) f32 (PyTorch layout); b: (1,) f32."""
    B, wsize = x.shape
    b2 = b.reshape(1, 1)  # SMEM wants a 2-D scalar block

    if B <= tile_b:
        # Single block, no grid: everything fits in VMEM, zero pipeline overhead.
        return pl.pallas_call(
            _linear_kernel,
            out_shape=jax.ShapeDtypeStruct((B, 1), x.dtype),
            in_specs=[
                pl.BlockSpec(memory_space=pltpu.MemorySpace.VMEM),
                pl.BlockSpec(memory_space=pltpu.MemorySpace.VMEM),
                pl.BlockSpec(memory_space=pltpu.MemorySpace.SMEM),
            ],
            out_specs=pl.BlockSpec(memory_space=pltpu.MemorySpace.VMEM),
        )(x, w, b2)

    # Batch-tiled path: large row tiles to hide HBM latency; "parallel" lets
    # Mosaic shard grid steps across both v7x TensorCores.
    # (tile_b is a multiple of 8; last dims equal full array dims.)
    grid = (pl.cdiv(B, tile_b),)
    return pl.pallas_call(
        _linear_kernel,
        out_shape=jax.ShapeDtypeStruct((B, 1), x.dtype),
        grid=grid,
        in_specs=[
            pl.BlockSpec((tile_b, wsize), lambda i: (i, 0)),
            pl.BlockSpec((1, wsize), lambda i: (0, 0)),
            pl.BlockSpec(memory_space=pltpu.MemorySpace.SMEM),
        ],
        out_specs=pl.BlockSpec((tile_b, 1), lambda i: (i, 0)),
        compiler_params=pltpu.CompilerParams(
            dimension_semantics=("parallel",),
        ),
    )(x, w, b2)


if __name__ == "__main__":
    wsize = 60
    batch = 8

    key = jax.random.PRNGKey(0)
    kx, kw, kb, kx2 = jax.random.split(key, 4)

    # Deterministic PyTorch-Linear-like uniform init.
    bound = 1.0 / (wsize ** 0.5)
    w = jax.random.uniform(kw, (1, wsize), jnp.float32, -bound, bound)
    b = jax.random.uniform(kb, (1,), jnp.float32, -bound, bound)

    # Small-batch (no-grid) path.
    x = jax.random.normal(kx, (batch, wsize), jnp.float32)
    out = jax.block_until_ready(simple_nn_forward(x, w, b))
    ref = x @ w.T + b
    assert out.shape == (batch, 1)
    assert jnp.allclose(out, ref, atol=1e-5, rtol=1e-5)

    # Exercise the batch-tiled ("parallel" grid) path as well.
    big_batch = 2048
    x_big = jax.random.normal(kx2, (big_batch, wsize), jnp.float32)
    out_big = jax.block_until_ready(simple_nn_forward(x_big, w, b))
    ref_big = x_big @ w.T + b
    assert out_big.shape == (big_batch, 1)
    assert jnp.allclose(out_big, ref_big, atol=1e-5, rtol=1e-5)

    print("KERNEL_OK")
</pallas_src>

<mosaic_0001>
module attributes {stable_mosaic.version = 11 : i64} {
  func.func @_linear_kernel(%arg0: memref<8x60xf32, #tpu.memory_space<vmem>>, %arg1: memref<1x60xf32, #tpu.memory_space<vmem>>, %arg2: memref<1x1xf32, #tpu.memory_space<smem>>, %arg3: memref<8x1xf32, #tpu.memory_space<vmem>>) attributes {dimension_semantics = [], scalar_prefetch = 0 : i64, scratch_operands = 0 : i64, tpu.core_type = #tpu.core_type<tc>} {
    %c0 = arith.constant 0 : index
    %c0_0 = arith.constant 0 : index
    %0 = memref.load %arg2[%c0, %c0_0] : memref<1x1xf32, #tpu.memory_space<smem>>
    %c0_1 = arith.constant 0 : index
    %c0_2 = arith.constant 0 : index
    %1 = vector.load %arg0[%c0_1, %c0_2] : memref<8x60xf32, #tpu.memory_space<vmem>>, vector<8x60xf32>
    %c0_3 = arith.constant 0 : index
    %c0_4 = arith.constant 0 : index
    %2 = vector.load %arg1[%c0_3, %c0_4] : memref<1x60xf32, #tpu.memory_space<vmem>>, vector<1x60xf32>
    %3 = vector.broadcast %2 : vector<1x60xf32> to vector<8x60xf32>
    %4 = arith.mulf %1, %3 : vector<8x60xf32>
    %cst = arith.constant dense<0.000000e+00> : vector<8xf32>
    %5 = vector.multi_reduction <add>, %4, %cst [1] : vector<8x60xf32> to vector<8xf32>
    %6 = vector.shape_cast %5 : vector<8xf32> to vector<8x1xf32>
    %7 = vector.broadcast %0 : f32 to vector<8x1xf32>
    %8 = arith.addf %6, %7 : vector<8x1xf32>
    %c0_5 = arith.constant 0 : index
    %c0_6 = arith.constant 0 : index
    %9 = vector.load %arg3[%c0_5, %c0_6] : memref<8x1xf32, #tpu.memory_space<vmem>>, vector<8x1xf32>
    tpu.vector_store %arg3[%c0_5, %c0_6], %8 {strides = array<i32>} : memref<8x1xf32, #tpu.memory_space<vmem>>, vector<8x1xf32>,
    return
  }
}

</mosaic_0001>

<bundles_post_ra>
// kernel: simple_nn_forward.1
= control target key start
LH: loop header
LB: loop body
LE: loop exit
PB: predicated region body
PF: predicated region fallthrough
CT: control target
= control target key end

     0   :  { %9 = vsyncpa [#allocation4], 0  ;;  %s77_s15 = smov [#allocation3]   ;;  %s110_s0 = inlined_call_operand.hbm [shape: f32[8,60], index: 0, kind: input, shape index: {}]   ;;  %s111_s1 = inlined_call_operand.vmem [shape: f32[1,60], index: 1, kind: input, shape index: {}]   ;;  %s112_s2 = inlined_call_operand.<no memory space> [shape: f32[1,1], index: 2, kind: input, shape index: {}]   ;;  %s113_s3 = inlined_call_operand.vmem [shape: f32[8,1], index: 3, kind: output, shape index: {}]  }
   0x1   :  { %s15_s14 = sshll.u32 %s110_s0, 4  ;;  %s17_s16 = sshll.u32 %s77_s15, 4  ;;  %s16_s14 = int_to_ptr.hbm [resolvable:$true] %s15_s14  ;;  %s18_s16 = int_to_ptr.vmem [resolvable:$true] %s17_s16 }
   0x2   :  { %20 = dma.hbm_to_vmem [thread:$0]  %s16_s14, 128, %s18_s16, [#allocation4]  }
   0x3   :  { %75 = dma.done.wait [#allocation4], 128  }
   0x4   :  { %76 = vsyncadd [#allocation4], 4294967168  ;;  %v30_v0 = vld [vmem:[#allocation3] sm:$0xff]  ;;  %vm36_vm0 = vcmask 490496   ;;  %v40_v4 = vstv %s112_s2  ;;  %vm42_vm1 = vcmask 7168  }
   0x5   :  { %v50_v1 = vld [vmem:[%s111_s1] ss:$0 sm:$0xff] }
   0x6   :  { %v35_v2 = vmul.f32 %v50_v1, %v30_v0 }
   0x8   :  { %v37_v3 = vsel %vm36_vm0, %v35_v2, 0.0 }
   0x9   :  { %38 = vadd.xlane.f32.xlu0 %v37_v3 }
  0x7c   :  { %v39_v5 = vpop.xlane.xlu0 %38 }
  0x7d   :  { %v41_v6 = vadd.f32 %v40_v4, %v39_v5 }
  0x7f   :  { %43 = vst.msk [vmem:[%s113_s3] sm:$0xff] %vm42_vm1, %v41_v6 }
  0x80   :  { %48 = vsyncpa [#allocation4], 1 }

</bundles_post_ra>
